<compile_context>
chip_gen: v7x
topology: tpu7x:2x2x1
jax: 0.10.0
libtpu: 0.0.40
codegen_flags: <defaults>
</compile_context>

<pallas_src>
import functools

import jax
import jax.numpy as jnp
import numpy as np
from jax.experimental import pallas as pl
from jax.experimental.pallas import tpu as pltpu


def _round_up(x, m):
    return ((x + m - 1) // m) * m


def _diag_weight_matrix(seq_len):
    """W[(i*S + j), k] = 1/count_k if M[i, j] belongs to output diagonal k, else 0.

    Encodes calculate_diagonals_partial exactly (lower diagonals for
    i = S//2-1 .. S-1, then upper diagonals for i = 0 .. S//2-1)."""
    n_out = seq_len + 1  # holds for even seq_len
    w = np.zeros((seq_len, seq_len, n_out), np.float32)
    k = 0
    # lower diagonals: entries (S-1-i+j, j), averaged over i+1 entries
    for i in range(seq_len // 2 - 1, seq_len):
        r = seq_len - 1 - i
        for j in range(i + 1):
            w[r + j, j, k] = 1.0 / float(i + 1)
        k += 1
    # upper diagonals: entries (j, j+i+1), averaged over S-1-i entries
    for i in range(seq_len // 2):
        for j in range(seq_len - 1 - i):
            w[j, j + i + 1, k] = 1.0 / float(seq_len - 1 - i)
        k += 1
    assert k == n_out
    return w.reshape(seq_len * seq_len, n_out)


def _mse_matrix_kernel(c1_ref, c2_ref, out_ref, g_acc, n1_acc, n2_acc,
                       *, true_d, tk, needs_mask):
    # c1_ref, c2_ref: (S, tk) lane-chunks of the flattened clips (native dtype)
    # out_ref:        (S, S)  scaled MSE matrix, written once at finalize
    # g_acc:          (S, S)  Gram accumulator  g[i, j] = <clip2_i, clip1_j>
    # n1_acc:         (1, S)  ||clip1_j||^2 accumulator (lane-dense row)
    # n2_acc:         (S, 1)  ||clip2_i||^2 accumulator (column; written once/step)
    k = pl.program_id(0)

    @pl.when(k == 0)
    def _init():
        g_acc[...] = jnp.zeros_like(g_acc)
        n1_acc[...] = jnp.zeros_like(n1_acc)
        n2_acc[...] = jnp.zeros_like(n2_acc)

    # Per-chunk cast to f32 inside the kernel (no wrapper-side astype pass).
    c1 = c1_ref[...].astype(jnp.float32)
    c2 = c2_ref[...].astype(jnp.float32)

    if needs_mask:
        # Last (partial) block: lanes beyond D are undefined; zeroing both
        # clips there contributes exactly zero to every pairwise MSE.
        lane = jax.lax.broadcasted_iota(jnp.int32, c1.shape, 1)
        valid = (k * tk + lane) < true_d
        c1 = jnp.where(valid, c1, 0.0)
        c2 = jnp.where(valid, c2, 0.0)

    # Common-reference centering: subtracting the same per-lane mean from both
    # clips leaves every pairwise difference unchanged (exact), but keeps the
    # ||a||^2 + ||b||^2 - 2 a.b combination away from catastrophic
    # cancellation when frames are nearly identical.
    m = 0.5 * (jnp.mean(c1, axis=0, keepdims=True)
               + jnp.mean(c2, axis=0, keepdims=True))          # (1, tk)
    a = c1 - m
    b = c2 - m

    # ||a_j||^2 as a (1, S) row via a ones-matvec (no transpose needed).
    ones_row = jnp.ones((1, a.shape[1]), jnp.float32)
    n1_acc[...] += jax.lax.dot_general(
        ones_row, a * a, (((1,), (1,)), ((), ())),
        preferred_element_type=jnp.float32)                     # (1, S)
    # ||b_i||^2 as a (S, 1) column via a lane reduce.
    n2_acc[...] += jnp.sum(b * b, axis=1, keepdims=True)        # (S, 1)
    # Gram: g[i, j] = b_i · a_j  (MXU, contraction over the lane chunk).
    g_acc[...] += jax.lax.dot_general(
        b, a, (((1,), (1,)), ((), ())),
        preferred_element_type=jnp.float32)                     # (S, S)

    @pl.when(k == pl.num_programs(0) - 1)
    def _finalize():
        scale = jnp.float32(-1.0e13 / float(true_d))
        # M[i, j] = -mean((clip1[j] - clip2[i])^2) * 1e13
        out_ref[...] = (n1_acc[...] + n2_acc[...] - 2.0 * g_acc[...]) * scale


def classification_forward(clip1, clip2, *, vmem_budget_bytes=8 * 1024 * 1024):
    """clip1, clip2: (S, C, H, W) arrays (S even). Returns float32 vector of length S+1."""
    S = clip1.shape[0]
    assert S % 2 == 0, "Classification assumes an even sequence length"
    assert clip1.shape == clip2.shape
    D = int(np.prod(clip1.shape[1:]))

    # Contiguous reshape only — keep native dtype, no astype / pad HBM passes.
    x1 = clip1.reshape(S, D)
    x2 = clip2.reshape(S, D)
    itemsize = x1.dtype.itemsize

    # Lane-chunk size from a VMEM budget: 2 inputs x 2 pipeline buffers of
    # (S, tk) must stay within ~vmem_budget_bytes.  Multiple of 128 lanes.
    d_pad = _round_up(D, 128)
    budget_lanes = max(128, (vmem_budget_bytes // (4 * S * itemsize)) // 128 * 128)
    tk = min(d_pad, budget_lanes)
    num_k = (D + tk - 1) // tk
    needs_mask = (num_k * tk != D)

    # Explicit scoped-VMEM limit with headroom (default scoped limit is
    # 16/32 MiB on v5e / v6e-v7x and could reject the larger blocks).
    input_block_bytes = 4 * S * tk * itemsize      # 2 inputs x 2 buffers
    vmem_limit = int(min(max(2 * input_block_bytes, 16 * 1024 * 1024),
                         64 * 1024 * 1024))

    kernel = functools.partial(_mse_matrix_kernel, true_d=D, tk=tk,
                               needs_mask=needs_mask)

    cost = pl.CostEstimate(
        flops=2 * S * S * D + 8 * S * D,            # Gram + norms/centering
        transcendentals=0,
        bytes_accessed=2 * S * D * itemsize + S * S * 4)

    mse_mat = pl.pallas_call(
        kernel,
        out_shape=jax.ShapeDtypeStruct((S, S), jnp.float32),
        grid=(num_k,),
        in_specs=[
            pl.BlockSpec((S, tk), lambda k: (0, k)),
            pl.BlockSpec((S, tk), lambda k: (0, k)),
        ],
        out_specs=pl.BlockSpec((S, S), lambda k: (0, 0)),
        scratch_shapes=[
            pltpu.VMEM((S, S), jnp.float32),   # Gram accumulator
            pltpu.VMEM((1, S), jnp.float32),   # ||clip1||^2 row
            pltpu.VMEM((S, 1), jnp.float32),   # ||clip2||^2 column
        ],
        compiler_params=pltpu.CompilerParams(
            dimension_semantics=("arbitrary",),
            vmem_limit_bytes=vmem_limit),
        cost_estimate=cost,
    )(x1, x2)

    # Diagonal averages as ONE tiny contraction with a static weight matrix
    # (kept out of the kernel pipeline per review: no W DMA / double-buffer,
    # no serialized per-row MXU dots; O(S^2) work vs the kernel's O(S^2 * D)).
    w_flat = jnp.asarray(_diag_weight_matrix(S))                 # (S*S, S+1)
    out = jnp.dot(mse_mat.reshape(1, S * S), w_flat,
                  preferred_element_type=jnp.float32)            # (1, S+1)
    return out[0]


def _reference_forward(clip1, clip2):
    """Plain-JAX reference mirroring the PyTorch module exactly."""
    S = clip1.shape[0]
    x1 = clip1.reshape(S, -1).astype(jnp.float32)
    x2 = clip2.reshape(S, -1).astype(jnp.float32)
    # M[i, j] = mse(clip1[j], clip2[i])
    M = -jnp.mean((x1[None, :, :] - x2[:, None, :]) ** 2, axis=-1) * 1.0e13
    vals = []
    for i in range(S // 2 - 1, S):
        temp = S - 1 - i
        s = 0.0
        for j in range(i + 1):
            s = s + M[temp, j]
            temp += 1
        vals.append(s / (i + 1))
    for i in range(S // 2):
        temp = i + 1
        s = 0.0
        for j in range(S - 1 - i):
            s = s + M[j, j + temp]
        vals.append(s / (S - 1 - i))
    return jnp.stack(vals)


if __name__ == "__main__":
    # Small shapes consistent with the module: 8-frame clips, each frame 4x16x16 (NCHW).
    S, C, H, W = 8, 4, 16, 16
    key = jax.random.PRNGKey(0)
    k1, k2 = jax.random.split(key)
    clip1 = jax.random.normal(k1, (S, C, H, W), dtype=jnp.float32)
    clip2 = jax.random.normal(k2, (S, C, H, W), dtype=jnp.float32)

    out = jax.block_until_ready(classification_forward(clip1, clip2))
    ref = jax.block_until_ready(_reference_forward(clip1, clip2))
    np.testing.assert_allclose(np.asarray(out), np.asarray(ref), rtol=1e-4)

    print("KERNEL_OK")
</pallas_src>

<mosaic_0001>
module attributes {stable_mosaic.version = 11 : i64} {
  func.func @_mse_matrix_kernel(%arg0: i32, %arg1: memref<8x1024xf32, #tpu.memory_space<vmem>>, %arg2: memref<8x1024xf32, #tpu.memory_space<vmem>>, %arg3: memref<8x8xf32, #tpu.memory_space<vmem>>, %arg4: memref<8x8xf32, #tpu.memory_space<vmem>>, %arg5: memref<1x8xf32, #tpu.memory_space<vmem>>, %arg6: memref<8x1xf32, #tpu.memory_space<vmem>>) attributes {dimension_semantics = [#tpu.dimension_semantics<arbitrary>], iteration_bounds = array<i64: 1>, scalar_prefetch = 0 : i64, scratch_operands = 3 : i64, tpu.core_type = #tpu.core_type<tc>, window_params = [{transform_indices = @transform_0, window_bounds = array<i64: 8, 1024>}, {transform_indices = @transform_1, window_bounds = array<i64: 8, 1024>}, {pipeline_mode = #tpu.pipeline_mode<synchronous>, transform_indices = @transform_2, window_bounds = array<i64: 8, 8>}]} {
    %c0_i32 = arith.constant 0 : i32
    %0 = arith.cmpi eq, %arg0, %c0_i32 : i32
    %1 = arith.extui %0 : i1 to i32
    %c0_i32_0 = arith.constant 0 : i32
    %2 = arith.cmpi ne, %1, %c0_i32_0 : i32
    scf.if %2 {
      %cst_26 = arith.constant 0.000000e+00 : f32
      %39 = vector.broadcast %cst_26 : f32 to vector<8x8xf32>
      %c0_27 = arith.constant 0 : index
      %c0_28 = arith.constant 0 : index
      %40 = vector.load %arg4[%c0_27, %c0_28] : memref<8x8xf32, #tpu.memory_space<vmem>>, vector<8x8xf32>
      tpu.vector_store %arg4[%c0_27, %c0_28], %39 {strides = array<i32>} : memref<8x8xf32, #tpu.memory_space<vmem>>, vector<8x8xf32>,
      %cst_29 = arith.constant 0.000000e+00 : f32
      %41 = vector.broadcast %cst_29 : f32 to vector<1x8xf32>
      %c0_30 = arith.constant 0 : index
      %c0_31 = arith.constant 0 : index
      %42 = vector.load %arg5[%c0_30, %c0_31] : memref<1x8xf32, #tpu.memory_space<vmem>>, vector<1x8xf32>
      tpu.vector_store %arg5[%c0_30, %c0_31], %41 {strides = array<i32>} : memref<1x8xf32, #tpu.memory_space<vmem>>, vector<1x8xf32>,
      %cst_32 = arith.constant 0.000000e+00 : f32
      %43 = vector.broadcast %cst_32 : f32 to vector<8x1xf32>
      %c0_33 = arith.constant 0 : index
      %c0_34 = arith.constant 0 : index
      %44 = vector.load %arg6[%c0_33, %c0_34] : memref<8x1xf32, #tpu.memory_space<vmem>>, vector<8x1xf32>
      tpu.vector_store %arg6[%c0_33, %c0_34], %43 {strides = array<i32>} : memref<8x1xf32, #tpu.memory_space<vmem>>, vector<8x1xf32>,
    } else {
    }
    %c0 = arith.constant 0 : index
    %c0_1 = arith.constant 0 : index
    %3 = vector.load %arg1[%c0, %c0_1] : memref<8x1024xf32, #tpu.memory_space<vmem>>, vector<8x1024xf32>
    %c0_2 = arith.constant 0 : index
    %c0_3 = arith.constant 0 : index
    %4 = vector.load %arg2[%c0_2, %c0_3] : memref<8x1024xf32, #tpu.memory_space<vmem>>, vector<8x1024xf32>
    %cst = arith.constant dense<0.000000e+00> : vector<1024xf32>
    %5 = vector.multi_reduction <add>, %3, %cst [0] : vector<8x1024xf32> to vector<1024xf32>
    %6 = vector.shape_cast %5 : vector<1024xf32> to vector<1x1024xf32>
    %cst_4 = arith.constant 8.000000e+00 : f32
    %7 = vector.broadcast %cst_4 : f32 to vector<1x1024xf32>
    %8 = arith.divf %6, %7 : vector<1x1024xf32>
    %cst_5 = arith.constant dense<0.000000e+00> : vector<1024xf32>
    %9 = vector.multi_reduction <add>, %4, %cst_5 [0] : vector<8x1024xf32> to vector<1024xf32>
    %10 = vector.shape_cast %9 : vector<1024xf32> to vector<1x1024xf32>
    %cst_6 = arith.constant 8.000000e+00 : f32
    %11 = vector.broadcast %cst_6 : f32 to vector<1x1024xf32>
    %12 = arith.divf %10, %11 : vector<1x1024xf32>
    %13 = arith.addf %8, %12 : vector<1x1024xf32>
    %cst_7 = arith.constant 5.000000e-01 : f32
    %14 = vector.broadcast %cst_7 : f32 to vector<1x1024xf32>
    %15 = arith.mulf %14, %13 : vector<1x1024xf32>
    %16 = vector.broadcast %15 : vector<1x1024xf32> to vector<8x1024xf32>
    %17 = arith.subf %3, %16 : vector<8x1024xf32>
    %18 = vector.broadcast %15 : vector<1x1024xf32> to vector<8x1024xf32>
    %19 = arith.subf %4, %18 : vector<8x1024xf32>
    %cst_8 = arith.constant 1.000000e+00 : f32
    %20 = vector.broadcast %cst_8 : f32 to vector<1x1024xf32>
    %c0_9 = arith.constant 0 : index
    %c0_10 = arith.constant 0 : index
    %21 = vector.load %arg5[%c0_9, %c0_10] : memref<1x8xf32, #tpu.memory_space<vmem>>, vector<1x8xf32>
    %22 = arith.mulf %17, %17 : vector<8x1024xf32>
    %cst_11 = arith.constant dense<0.000000e+00> : vector<1x8xf32>
    %23 = tpu.matmul %20, %22, %cst_11 {dimension_numbers = #tpu.dot_dimension_numbers<[1], [1], [0], [0], [0, 0, 1, 0], [], []>} : vector<1x1024xf32>, vector<8x1024xf32>, vector<1x8xf32> -> vector<1x8xf32>
    %24 = arith.addf %21, %23 : vector<1x8xf32>
    %c0_12 = arith.constant 0 : index
    %c0_13 = arith.constant 0 : index
    %25 = vector.load %arg5[%c0_12, %c0_13] : memref<1x8xf32, #tpu.memory_space<vmem>>, vector<1x8xf32>
    tpu.vector_store %arg5[%c0_12, %c0_13], %24 {strides = array<i32>} : memref<1x8xf32, #tpu.memory_space<vmem>>, vector<1x8xf32>,
    %c0_14 = arith.constant 0 : index
    %c0_15 = arith.constant 0 : index
    %26 = vector.load %arg6[%c0_14, %c0_15] : memref<8x1xf32, #tpu.memory_space<vmem>>, vector<8x1xf32>
    %27 = arith.mulf %19, %19 : vector<8x1024xf32>
    %cst_16 = arith.constant dense<0.000000e+00> : vector<8xf32>
    %28 = vector.multi_reduction <add>, %27, %cst_16 [1] : vector<8x1024xf32> to vector<8xf32>
    %29 = vector.shape_cast %28 : vector<8xf32> to vector<8x1xf32>
    %30 = arith.addf %26, %29 : vector<8x1xf32>
    %c0_17 = arith.constant 0 : index
    %c0_18 = arith.constant 0 : index
    %31 = vector.load %arg6[%c0_17, %c0_18] : memref<8x1xf32, #tpu.memory_space<vmem>>, vector<8x1xf32>
    tpu.vector_store %arg6[%c0_17, %c0_18], %30 {strides = array<i32>} : memref<8x1xf32, #tpu.memory_space<vmem>>, vector<8x1xf32>,
    %c0_19 = arith.constant 0 : index
    %c0_20 = arith.constant 0 : index
    %32 = vector.load %arg4[%c0_19, %c0_20] : memref<8x8xf32, #tpu.memory_space<vmem>>, vector<8x8xf32>
    %cst_21 = arith.constant dense<0.000000e+00> : vector<8x8xf32>
    %33 = tpu.matmul %19, %17, %cst_21 {dimension_numbers = #tpu.dot_dimension_numbers<[1], [1], [0], [0], [0, 0, 1, 0], [], []>} : vector<8x1024xf32>, vector<8x1024xf32>, vector<8x8xf32> -> vector<8x8xf32>
    %34 = arith.addf %32, %33 : vector<8x8xf32>
    %c0_22 = arith.constant 0 : index
    %c0_23 = arith.constant 0 : index
    %35 = vector.load %arg4[%c0_22, %c0_23] : memref<8x8xf32, #tpu.memory_space<vmem>>, vector<8x8xf32>
    tpu.vector_store %arg4[%c0_22, %c0_23], %34 {strides = array<i32>} : memref<8x8xf32, #tpu.memory_space<vmem>>, vector<8x8xf32>,
    %c0_i32_24 = arith.constant 0 : i32
    %36 = arith.cmpi eq, %arg0, %c0_i32_24 : i32
    %37 = arith.extui %36 : i1 to i32
    %c0_i32_25 = arith.constant 0 : i32
    %38 = arith.cmpi ne, %37, %c0_i32_25 : i32
    scf.if %38 {
      %c0_26 = arith.constant 0 : index
      %c0_27 = arith.constant 0 : index
      %39 = vector.load %arg5[%c0_26, %c0_27] : memref<1x8xf32, #tpu.memory_space<vmem>>, vector<1x8xf32>
      %c0_28 = arith.constant 0 : index
      %c0_29 = arith.constant 0 : index
      %40 = vector.load %arg6[%c0_28, %c0_29] : memref<8x1xf32, #tpu.memory_space<vmem>>, vector<8x1xf32>
      %41 = vector.broadcast %39 : vector<1x8xf32> to vector<8x8xf32>
      %42 = vector.broadcast %40 : vector<8x1xf32> to vector<8x8xf32>
      %43 = arith.addf %41, %42 : vector<8x8xf32>
      %c0_30 = arith.constant 0 : index
      %c0_31 = arith.constant 0 : index
      %44 = vector.load %arg4[%c0_30, %c0_31] : memref<8x8xf32, #tpu.memory_space<vmem>>, vector<8x8xf32>
      %cst_32 = arith.constant 2.000000e+00 : f32
      %45 = vector.broadcast %cst_32 : f32 to vector<8x8xf32>
      %46 = arith.mulf %45, %44 : vector<8x8xf32>
      %47 = arith.subf %43, %46 : vector<8x8xf32>
      %cst_33 = arith.constant -9.76562483E+9 : f32
      %48 = vector.broadcast %cst_33 : f32 to vector<8x8xf32>
      %49 = arith.mulf %47, %48 : vector<8x8xf32>
      %c0_34 = arith.constant 0 : index
      %c0_35 = arith.constant 0 : index
      %50 = vector.load %arg3[%c0_34, %c0_35] : memref<8x8xf32, #tpu.memory_space<vmem>>, vector<8x8xf32>
      tpu.vector_store %arg3[%c0_34, %c0_35], %49 {strides = array<i32>} : memref<8x8xf32, #tpu.memory_space<vmem>>, vector<8x8xf32>,
    } else {
    }
    return
  }
  func.func @transform_0(%arg0: i32) -> (i32, i32) {
    %c0_i32 = arith.constant 0 : i32
    %c0_i32_0 = arith.constant 0 : i32
    return %c0_i32, %arg0 : i32, i32
  }
  func.func @transform_1(%arg0: i32) -> (i32, i32) {
    %c0_i32 = arith.constant 0 : i32
    %c0_i32_0 = arith.constant 0 : i32
    return %c0_i32, %arg0 : i32, i32
  }
  func.func @transform_2(%arg0: i32) -> (i32, i32) {
    %c0_i32 = arith.constant 0 : i32
    %c0_i32_0 = arith.constant 0 : i32
    %c0_i32_1 = arith.constant 0 : i32
    return %c0_i32, %c0_i32_0 : i32, i32
  }
}

</mosaic_0001>

<bundles_post_ra>
// kernel: tpu_custom_call.1
= control target key start
LH: loop header
LB: loop body
LE: loop exit
PB: predicated region body
PF: predicated region fallthrough
CT: control target
= control target key end

     0   :  { %7 = vsyncpa [#allocation6], 0  ;;  %s1106_s0 = inlined_call_operand.hbm [shape: f32[8,1024], index: 0, kind: input, shape index: {}]   ;;  %s1107_s1 = inlined_call_operand.hbm [shape: f32[8,1024], index: 1, kind: input, shape index: {}]   ;;  %s1108_s2 = inlined_call_operand.hbm [shape: f32[8,8], index: 2, kind: output, shape index: {}]  }
   0x1   :  { %8 = vsyncpa [#allocation9], 0 }
   0x2   :  { %9 = vsyncpa [#allocation7], 0  ;;  %s922_s9 = smov [#allocation5]   ;;  %s923_s11 = smov [#allocation8]  }
   0x3   :  { %s16_s10 = sshll.u32 %s922_s9, 4  ;;  %s26_s12 = sshll.u32 %s923_s11, 4  ;;  %s17_s10 = int_to_ptr.vmem [resolvable:$true] %s16_s10  ;;  %s27_s12 = int_to_ptr.vmem [resolvable:$true] %s26_s12 }
   0x4   :  { %s850_s15 = scalar_lea.hbm %s1106_s0, 1024 }
   0x5   :  { %p851_p0 = scmp.ne.s32.totalorder %s1106_s0, %s850_s15  ;;  %p854_p1 = scmp.lt.u32.totalorder %s850_s15, %s1106_s0 }
   0x7   :  { %p856_p2 = pnand %p854_p1, %p851_p0 }
   0x9   :  { %859 = shalt.err (!%p856_p2)
}
   0xa   :  { %s860_s20 = scalar_lea.vmem %s17_s10, 1024  ;;  %p865_p4 = scmp.lt.s32.totalorder %s17_s10, %s17_s10 }
   0xb   :  { %p861_p3 = scmp.ne.s32.totalorder %s17_s10, %s860_s20  ;;  %p866_p5 = scmp.lt.s32.totalorder %s860_s20, %s860_s20 }
   0xd   :  { %p867_p6 = por %p866_p5, %p865_p4 }
   0xf   :  { %p868_p7 = pnand %p867_p6, %p861_p3 }
  0x11   :  { %871 = shalt.err (!%p868_p7)
}
  0x12   :  { %19 = dma.hbm_to_vmem [thread:$0]  %s1106_s0, 1024, %s17_s10, [#allocation6]  }
  0x13   :  { %s872_s25 = scalar_lea.hbm %s1107_s1, 1024 }
  0x14   :  { %p873_p8 = scmp.ne.s32.totalorder %s1107_s1, %s872_s25  ;;  %p876_p9 = scmp.lt.u32.totalorder %s872_s25, %s1107_s1 }
  0x16   :  { %p878_p10 = pnand %p876_p9, %p873_p8 }
  0x18   :  { %881 = shalt.err (!%p878_p10)
}
  0x19   :  { %s882_s30 = scalar_lea.vmem %s27_s12, 1024  ;;  %p887_p12 = scmp.lt.s32.totalorder %s27_s12, %s27_s12 }
  0x1a   :  { %p883_p11 = scmp.ne.s32.totalorder %s27_s12, %s882_s30  ;;  %p888_p13 = scmp.lt.s32.totalorder %s882_s30, %s882_s30 }
  0x1c   :  { %p889_p0 = por %p888_p13, %p887_p12 }
  0x1e   :  { %p890_p1 = pnand %p889_p0, %p883_p11 }
  0x20   :  { %893 = shalt.err (!%p890_p1)
}
  0x21   :  { %29 = dma.hbm_to_vmem [thread:$0]  %s1107_s1, 1024, %s27_s12, [#allocation9]  }
  0x22   :  { %916 = dma.done.wait [#allocation6], 1024  }
  0x23   :  { %917 = vsyncadd [#allocation6], 4294966272 }
  0x24   :  { %918 = dma.done.wait [#allocation9], 1024  }
  0x25   :  { %919 = vsyncadd [#allocation9], 4294966272  ;;  %vm44_vm0 = vcmask 7168   ;;  %v924_v0 = vmov 1.0   ;;  %v925_v1 = vmov 0.0   ;;  %v971_v2 = vld [vmem:[#allocation5] sm:$0xff] }
  0x26   :  { %280 = vmatprep.mubr.f32.mxu0 %v924_v0  ;;  %350 = vmatprep.mubr.f32.mxu1 %v924_v0  ;;  %45 = vst.msk [vmem:[#allocation4] sm:$0xff] %vm44_vm0, %v925_v1  ;;  %v973_v3 = vld [vmem:[#allocation5 + $0x8] sm:$0xff]  ;;  %v975_v4 = vld [vmem:[#allocation5 + $0x10] sm:$0xff]  ;;  %v977_v5 = vld [vmem:[#allocation5 + $0x18] sm:$0xff]  ;;  %v62_v8 = vrot.slane %v971_v2, 4  ;;  %vm42_vm1 = vcmask 57344  }
  0x27   :  { %v979_v6 = vld [vmem:[#allocation5 + $0x20] sm:$0xff]  ;;  %v981_v7 = vld [vmem:[#allocation5 + $0x28] sm:$0xff]  ;;  %v68_v9 = vrot.slane %v973_v3, 4  ;;  %v74_v10 = vrot.slane %v975_v4, 4  ;;  %v986_v11 = vld [vmem:[#allocation5 + $0x30] sm:$0xff]  ;;  %v80_v13 = vrot.slane %v977_v5, 4 }
  0x28   :  { %v988_v12 = vld [vmem:[#allocation5 + $0x38] sm:$0xff]  ;;  %v86_v14 = vrot.slane %v979_v6, 4  ;;  %v92_v15 = vrot.slane %v981_v7, 4  ;;  %v63_v16 = vadd.f32 %v62_v8, %v971_v2  ;;  %v98_v19 = vrot.slane %v986_v11, 4  ;;  %v1003_v52 = vld [vmem:[#allocation8] sm:$0xff]  ;;  %v1005_v53 = vld [vmem:[#allocation8 + $0x8] sm:$0xff] }
  0x29   :  { %v69_v17 = vadd.f32 %v68_v9, %v973_v3  ;;  %v75_v18 = vadd.f32 %v74_v10, %v975_v4  ;;  %v81_v20 = vadd.f32 %v80_v13, %v977_v5  ;;  %v104_v23 = vrot.slane %v988_v12, 4  ;;  %v1007_v54 = vld [vmem:[#allocation8 + $0x10] sm:$0xff]  ;;  %v1009_v59 = vld [vmem:[#allocation8 + $0x18] sm:$0xff]  ;;  %v1011_v60 = vld [vmem:[#allocation8 + $0x20] sm:$0xff]  ;;  %43 = vst.msk [vmem:[#allocation3] sm:$0x1] %vm42_vm1, %v925_v1 }
  0x2a   :  { %v87_v21 = vadd.f32 %v86_v14, %v979_v6  ;;  %v93_v22 = vadd.f32 %v92_v15, %v981_v7  ;;  %v64_v24 = vrot.slane %v63_v16, 2  ;;  %v99_v27 = vadd.f32 %v98_v19, %v986_v11  ;;  %v1013_v61 = vld [vmem:[#allocation8 + $0x28] sm:$0xff]  ;;  %v1021_v10 = vld [vmem:[#allocation8 + $0x30] sm:$0xff]  ;;  %s927_s1 = smov [#allocation10]  }
  0x2b   :  { %v70_v25 = vrot.slane %v69_v17, 2  ;;  %v76_v26 = vrot.slane %v75_v18, 2  ;;  %v82_v28 = vrot.slane %v81_v20, 2  ;;  %v105_v31 = vadd.f32 %v104_v23, %v988_v12  ;;  %s832_s4 = sshll.u32 %s927_s1, 4  ;;  %s833_s4 = int_to_ptr.vmem [resolvable:$true] %s832_s4 }
  0x2c   :  { %v88_v29 = vrot.slane %v87_v21, 2  ;;  %v94_v30 = vrot.slane %v93_v22, 2  ;;  %v65_v32 = vadd.f32 %v64_v24, %v63_v16  ;;  %v100_v35 = vrot.slane %v99_v27, 2  ;;  %s894_s5 = scalar_lea.vmem %s833_s4, 128  ;;  %p899_p3 = scmp.lt.s32.totalorder %s833_s4, %s833_s4 }
  0x2d   :  { %v71_v33 = vadd.f32 %v70_v25, %v69_v17  ;;  %v77_v34 = vadd.f32 %v76_v26, %v75_v18  ;;  %v83_v36 = vadd.f32 %v82_v28, %v81_v20  ;;  %v106_v39 = vrot.slane %v105_v31, 2  ;;  %v1029_v17 = vld [vmem:[#allocation8 + $0x38] sm:$0xff]  ;;  %p895_p2 = scmp.ne.s32.totalorder %s833_s4, %s894_s5  ;;  %p900_p4 = scmp.lt.s32.totalorder %s894_s5, %s894_s5 }
  0x2e   :  { %v89_v37 = vadd.f32 %v88_v29, %v87_v21  ;;  %v95_v38 = vadd.f32 %v94_v30, %v93_v22  ;;  %v66_v40 = vrot.slane %v65_v32, 1  ;;  %v101_v43 = vadd.f32 %v100_v35, %v99_v27 }
  0x2f   :  { %v72_v41 = vrot.slane %v71_v33, 1  ;;  %v78_v42 = vrot.slane %v77_v34, 1  ;;  %v84_v44 = vrot.slane %v83_v36, 1  ;;  %v107_v47 = vadd.f32 %v106_v39, %v105_v31  ;;  %p901_p5 = por %p900_p4, %p899_p3 }
  0x30   :  { %v90_v45 = vrot.slane %v89_v37, 1  ;;  %v96_v46 = vrot.slane %v95_v38, 1  ;;  %v67_v48 = vadd.f32 %v66_v40, %v65_v32  ;;  %v102_v51 = vrot.slane %v101_v43, 1 }
  0x31   :  { %v73_v49 = vadd.f32 %v72_v41, %v71_v33  ;;  %v79_v50 = vadd.f32 %v78_v42, %v77_v34  ;;  %v85_v55 = vadd.f32 %v84_v44, %v83_v36  ;;  %v108_v58 = vrot.slane %v107_v47, 1  ;;  %p902_p6 = pnand %p901_p5, %p895_p2 }
  0x32   :  { %v91_v56 = vadd.f32 %v90_v45, %v89_v37  ;;  %v97_v57 = vadd.f32 %v96_v46, %v95_v38  ;;  %v103_v62 = vadd.f32 %v102_v51, %v101_v43  ;;  %v1015_v63 = vmul.f32 0.125, %v67_v48 }
  0x33   :  { %v1017_v8 = vmul.f32 0.125, %v73_v49  ;;  %v1019_v9 = vmul.f32 0.125, %v79_v50  ;;  %v109_v13 = vadd.f32 %v108_v58, %v107_v47  ;;  %v1023_v14 = vmul.f32 0.125, %v85_v55 }
  0x34   :  { %v1025_v15 = vmul.f32 0.125, %v91_v56  ;;  %v1027_v16 = vmul.f32 0.125, %v97_v57  ;;  %v1031_v18 = vmul.f32 0.125, %v103_v62  ;;  %v119_v19 = vrot.slane %v1003_v52, 4 }
  0x35   :  { %v125_v20 = vrot.slane %v1005_v53, 4  ;;  %v131_v21 = vrot.slane %v1007_v54, 4  ;;  %v1036_v22 = vmul.f32 0.125, %v109_v13  ;;  %v137_v23 = vrot.slane %v1009_v59, 4 }
  0x36   :  { %v143_v24 = vrot.slane %v1011_v60, 4  ;;  %v149_v25 = vrot.slane %v1013_v61, 4  ;;  %v120_v26 = vadd.f32 %v119_v19, %v1003_v52  ;;  %v155_v29 = vrot.slane %v1021_v10, 4 }
  0x37   :  { %v126_v27 = vadd.f32 %v125_v20, %v1005_v53  ;;  %v132_v28 = vadd.f32 %v131_v21, %v1007_v54  ;;  %v138_v30 = vadd.f32 %v137_v23, %v1009_v59  ;;  %v161_v33 = vrot.slane %v1029_v17, 4 }
  0x38   :  { %v144_v31 = vadd.f32 %v143_v24, %v1011_v60  ;;  %v150_v32 = vadd.f32 %v149_v25, %v1013_v61  ;;  %v121_v34 = vrot.slane %v120_v26, 2  ;;  %v156_v37 = vadd.f32 %v155_v29, %v1021_v10 }
  0x39   :  { %v127_v35 = vrot.slane %v126_v27, 2  ;;  %v133_v36 = vrot.slane %v132_v28, 2  ;;  %v139_v38 = vrot.slane %v138_v30, 2  ;;  %v162_v41 = vadd.f32 %v161_v33, %v1029_v17 }
  0x3a   :  { %v145_v39 = vrot.slane %v144_v31, 2  ;;  %v151_v40 = vrot.slane %v150_v32, 2  ;;  %v122_v42 = vadd.f32 %v121_v34, %v120_v26  ;;  %v157_v45 = vrot.slane %v156_v37, 2 }
  0x3b   :  { %v128_v43 = vadd.f32 %v127_v35, %v126_v27  ;;  %v134_v44 = vadd.f32 %v133_v36, %v132_v28  ;;  %v140_v46 = vadd.f32 %v139_v38, %v138_v30  ;;  %v163_v49 = vrot.slane %v162_v41, 2 }
  0x3c   :  { %v146_v47 = vadd.f32 %v145_v39, %v144_v31  ;;  %v152_v48 = vadd.f32 %v151_v40, %v150_v32  ;;  %v123_v50 = vrot.slane %v122_v42, 1  ;;  %v158_v56 = vadd.f32 %v157_v45, %v156_v37 }
  0x3d   :  { %v129_v51 = vrot.slane %v128_v43, 1  ;;  %v135_v55 = vrot.slane %v134_v44, 1  ;;  %v141_v57 = vrot.slane %v140_v46, 1  ;;  %v164_v13 = vadd.f32 %v163_v49, %v162_v41 }
  0x3e   :  { %v147_v58 = vrot.slane %v146_v47, 1  ;;  %v153_v62 = vrot.slane %v152_v48, 1  ;;  %v124_v19 = vadd.f32 %v123_v50, %v122_v42  ;;  %v159_v23 = vrot.slane %v158_v56, 1 }
  0x3f   :  { %v130_v20 = vadd.f32 %v129_v51, %v128_v43  ;;  %v136_v21 = vadd.f32 %v135_v55, %v134_v44  ;;  %v142_v24 = vadd.f32 %v141_v57, %v140_v46  ;;  %v165_v27 = vrot.slane %v164_v13, 1 }
  0x40   :  { %v148_v25 = vadd.f32 %v147_v58, %v146_v47  ;;  %v154_v26 = vadd.f32 %v153_v62, %v152_v48  ;;  %v160_v28 = vadd.f32 %v159_v23, %v158_v56  ;;  %v167_v29 = vmul.f32 0.125, %v124_v19 }
  0x41   :  { %v168_v30 = vmul.f32 0.125, %v130_v20  ;;  %v169_v31 = vmul.f32 0.125, %v136_v21  ;;  %v166_v32 = vadd.f32 %v165_v27, %v164_v13  ;;  %v170_v33 = vmul.f32 0.125, %v142_v24 }
  0x42   :  { %v171_v34 = vmul.f32 0.125, %v148_v25  ;;  %v172_v35 = vmul.f32 0.125, %v154_v26  ;;  %v173_v36 = vmul.f32 0.125, %v160_v28  ;;  %v175_v37 = vadd.f32 %v167_v29, %v1015_v63 }
  0x43   :  { %v176_v38 = vadd.f32 %v168_v30, %v1017_v8  ;;  %v177_v39 = vadd.f32 %v169_v31, %v1019_v9  ;;  %v174_v40 = vmul.f32 0.125, %v166_v32  ;;  %v178_v41 = vadd.f32 %v170_v33, %v1023_v14 }
  0x44   :  { %v179_v42 = vadd.f32 %v171_v34, %v1025_v15  ;;  %v180_v43 = vadd.f32 %v172_v35, %v1027_v16  ;;  %v181_v44 = vadd.f32 %v173_v36, %v1031_v18  ;;  %v183_v45 = vmul.f32 0.5, %v175_v37 }
  0x45   :  { %v184_v46 = vmul.f32 0.5, %v176_v38  ;;  %v185_v47 = vmul.f32 0.5, %v177_v39  ;;  %v182_v48 = vadd.f32 %v174_v40, %v1036_v22  ;;  %v186_v49 = vmul.f32 0.5, %v178_v41 }
  0x46   :  { %v187_v63 = vmul.f32 0.5, %v179_v42  ;;  %v188_v50 = vmul.f32 0.5, %v180_v43  ;;  %v189_v8 = vmul.f32 0.5, %v181_v44  ;;  %v199_v9 = vsub.f32 %v1003_v52, %v183_v45  ;;  %v207_v44 = vld [vmem:[#allocation3] sm:$0x1] }
  0x47   :  { %v200_v51 = vsub.f32 %v1005_v53, %v184_v46  ;;  %v201_v14 = vsub.f32 %v1007_v54, %v185_v47  ;;  %v202_v15 = vsub.f32 %v1009_v59, %v186_v49  ;;  %v190_v57 = vmul.f32 0.5, %v182_v48 }
  0x48   :  { %v1064_v16 = vsub.f32 %v1011_v60, %v187_v63  ;;  %v500_v18 = vmul.f32 %v199_v9, %v199_v9  ;;  %v204_v22 = vsub.f32 %v1013_v61, %v188_v50  ;;  %v205_v58 = vsub.f32 %v1021_v10, %v189_v8 }
  0x49   :  { %v501_v55 = vmul.f32 %v200_v51, %v200_v51  ;;  %v502_v56 = vmul.f32 %v201_v14, %v201_v14  ;;  %v503_v62 = vmul.f32 %v202_v15, %v202_v15  ;;  %v192_v52 = vsub.f32 %v973_v3, %v184_v46 }
  0x4a   :  { %v191_v53 = vsub.f32 %v971_v2, %v183_v45  ;;  %v504_v54 = vmul.f32 %v1064_v16, %v1064_v16  ;;  %v194_v59 = vsub.f32 %v977_v5, %v186_v49  ;;  %v193_v60 = vsub.f32 %v975_v4, %v185_v47 }
  0x4b   :  { %v508_v13 = vadd.f32 %v501_v55, %v500_v18  ;;  %v196_v19 = vsub.f32 %v981_v7, %v188_v50  ;;  %v209_v21 = vmul.f32 %v192_v52, %v192_v52  ;;  %v195_v10 = vsub.f32 %v979_v6, %v187_v63 }
  0x4c   :  { %v208_v61 = vmul.f32 %v191_v53, %v191_v53  ;;  %v211_v23 = vmul.f32 %v194_v59, %v194_v59  ;;  %v210_v24 = vmul.f32 %v193_v60, %v193_v60  ;;  %v198_v3 = vsub.f32 %v988_v12, %v190_v57 }
  0x4d   :  { %v509_v20 = vadd.f32 %v508_v13, %v502_v56  ;;  %v213_v25 = vmul.f32 %v196_v19, %v196_v19  ;;  %v206_v2 = vsub.f32 %v1029_v17, %v190_v57  ;;  %v505_v26 = vmul.f32 %v204_v22, %v204_v22  ;;  %216 = vmatprep.subr.mxu0 %v209_v21 }
  0x4e   :  { %v197_v5 = vsub.f32 %v986_v11, %v189_v8  ;;  %217 = vmatpush1.xpose.msra.mxu0 %v208_v61  ;;  %286 = vmatprep.subr.mxu1 %v211_v23  ;;  %v212_v4 = vmul.f32 %v195_v10, %v195_v10  ;;  %v215_v7 = vmul.f32 %v198_v3, %v198_v3  ;;  %v926_v17 = vmov 0  }
  0x4f   :  { %v510_v27 = vadd.f32 %v509_v20, %v503_v62  ;;  %v506_v28 = vmul.f32 %v205_v58, %v205_v58  ;;  %287 = vmatpush1.xpose.msra.mxu1 %v210_v24  ;;  %356 = vmatprep.subr.mxu0 %v213_v25  ;;  %v507_v30 = vmul.f32 %v206_v2, %v206_v2  ;;  %vm40_vm2 = vcmask 64512  }
  0x50   :  { %v214_v6 = vmul.f32 %v197_v5, %v197_v5  ;;  %426 = vmatprep.subr.mxu1 %v215_v7  ;;  %849 = vset.pattern.permute.xlu0 %v926_v17  ;;  %41 = vst.msk [vmem:[#allocation2] sm:$0xff] %vm40_vm2, %v925_v1 }
  0x51   :  { %v511_v29 = vadd.f32 %v510_v27, %v504_v54  ;;  %281 = vmatmul.mubr.f32.vlgmr.msra.gmra.mrb[0].mxu0 %v924_v0 }
  0x52   :  { %357 = vmatpush1.xpose.msra.mxu0 %v212_v4  ;;  %351 = vmatmul.mubr.f32.vlgmr.msra.gmra.mrb[0].mxu1 %v924_v0 }
  0x53   :  { %v512_v31 = vadd.f32 %v511_v29, %v505_v26  ;;  %420 = vmatprep.mubr.f32.mxu0 %v924_v0  ;;  %427 = vmatpush1.xpose.msra.mxu1 %v214_v6 }
  0x54   :  { %521 = vmatprep.subr.mxu0 %v192_v52  ;;  %490 = vmatprep.mubr.f32.mxu1 %v924_v0 }
  0x55   :  { %v513_v12 = vadd.f32 %v512_v31, %v506_v28  ;;  %421 = vmatmul.mubr.f32.vlgmr.msra.gmra.mrb[2].mxu0 %v924_v0  ;;  %591 = vmatprep.subr.mxu1 %v194_v59 }
  0x56   :  { %522 = vmatpush1.xpose.msra.mxu0 %v191_v53  ;;  %491 = vmatmul.mubr.f32.vlgmr.msra.gmra.mrb[2].mxu1 %v924_v0  ;;  %v499_v0 = vld [vmem:[#allocation4] sm:$0xff] }
  0x57   :  { %v514_v11 = vadd.f32 %v513_v12, %v507_v30  ;;  %585 = vmatprep.mubr.f32.mxu0 %v200_v51  ;;  %592 = vmatpush1.xpose.msra.mxu1 %v193_v60 }
  0x58   :  { %661 = vmatprep.subr.mxu0 %v196_v19  ;;  %655 = vmatprep.mubr.f32.mxu1 %v202_v15 }
  0x59   :  { %515 = vadd.xlane.f32.xlu0 %v514_v11  ;;  %586 = vmatmul.mubr.f32.vlgmr.msra.gmra.mrb[4].mxu0 %v199_v9 }
  0x5a   :  { %662 = vmatpush1.xpose.msra.mxu0 %v195_v10  ;;  %731 = vmatprep.subr.mxu1 %v198_v3 }
  0x5b   :  { %656 = vmatmul.mubr.f32.vlgmr.msra.gmra.mrb[4].mxu1 %v201_v14  ;;  %725 = vmatprep.mubr.f32.mxu0 %v204_v22  ;;  %v520_v14 = vld [vmem:[#allocation2] sm:$0xff] }
  0x5c   :  { %732 = vmatpush1.xpose.msra.mxu1 %v197_v5  ;;  %795 = vmatprep.mubr.f32.mxu1 %v206_v2 }
  0x5d   :  { %726 = vmatmul.mubr.f32.vlgmr.msra.gmra.mrb[6].mxu0 %v1064_v16 }
  0x5f   :  { %796 = vmatmul.mubr.f32.vlgmr.msra.gmra.mrb[6].mxu1 %v205_v58 }
  0xe6   :  { %v516_v32 = vpop.xlane.xlu0 %515 }
  0xe7   :  { %v517_v33 = vadd.f32 %v516_v32, %v499_v0 }
  0xe9   :  { %519 = vst.msk [vmem:[#allocation4] sm:$0xff] %vm44_vm0, %v517_v33 }
  0xf0   :  { %v808_v34 = vld [vmem:[#allocation4] sm:$0xff] }
  0xf1   :  { %817 = vperm.xlu0 %849, %v808_v34  }
 0x124   :  { %v282_v35 = vpop.f32.mrb[0].mxu0 }
 0x125   :  { %v284_v36 = vpop.f32.mrb[1].mxu0  ;;  %v352_v37 = vpop.f32.mrb[0].mxu1 }
 0x126   :  { %v353_v38 = vadd.f32 %v352_v37, %v282_v35  ;;  %v354_v39 = vpop.f32.mrb[1].mxu1 }
 0x128   :  { %v422_v40 = vpop.f32.mrb[2].mxu0 }
 0x129   :  { %v423_v41 = vadd.f32 %v422_v40, %v353_v38  ;;  %v424_v42 = vpop.f32.mrb[3].mxu0  ;;  %v492_v43 = vpop.f32.mrb[2].mxu1 }
 0x12a   :  { %v494_v45 = vpop.f32.mrb[3].mxu1 }
 0x12b   :  { %v493_v46 = vadd.f32 %v492_v43, %v423_v41 }
 0x12c   :  { %v587_v1 = vpop.f32.mrb[4].mxu0 }
 0x12d   :  { %v496_v47 = vadd.f32 %v493_v46, %v207_v44  ;;  %v589_v48 = vpop.f32.mrb[5].mxu0 }
 0x12e   :  { %v657_v49 = vpop.f32.mrb[4].mxu1 }
 0x12f   :  { %498 = vst.msk [vmem:[#allocation3] sm:$0x1] %vm42_vm1, %v496_v47  ;;  %v658_v63 = vadd.f32 %v657_v49, %v587_v1  ;;  %v659_v50 = vpop.f32.mrb[5].mxu1 }
 0x130   :  { %v727_v8 = vpop.f32.mrb[6].mxu0 }
 0x131   :  { %v728_v9 = vadd.f32 %v727_v8, %v658_v63  ;;  %v729_v51 = vpop.f32.mrb[7].mxu0 }
 0x132   :  { %v797_v15 = vpop.f32.mrb[6].mxu1 }
 0x133   :  { %v798_v16 = vadd.f32 %v797_v15, %v728_v9  ;;  %v799_v18 = vpop.f32.mrb[7].mxu1 }
 0x135   :  { %v801_v55 = vadd.f32 %v798_v16, %v520_v14 }
 0x136   :  { %v842_v22 = vld [vmem:[#allocation3] ss:$0 sm:$0xff] }
 0x137   :  { %803 = vst.msk [vmem:[#allocation2] sm:$0xff] %vm40_vm2, %v801_v55 }
 0x13e   :  { %v821_v56 = vld [vmem:[#allocation2] sm:$0xff] }
 0x13f   :  { %v822_v62 = vmul.f32 2.0, %v821_v56 }
 0x170   :  { %v818_v57 = vpop.permute.xlu0 %817 }
 0x171   :  { %v820_v58 = vadd.f32 %v842_v22, %v818_v57 }
 0x173   :  { %v823_v13 = vsub.f32 %v820_v58, %v822_v62 }
 0x175   :  { %v824_v52 = vmul.f32 -9.765625e+09, %v823_v13 }
 0x177   :  { %825 = vst.msk [vmem:[#allocation10] sm:$0xff] %vm40_vm2, %v824_v52 }
 0x178   :  { %905 = shalt.err (!%p902_p6)
}
 0x179   :  { %s906_s8 = scalar_lea.hbm %s1108_s2, 128 }
 0x17a   :  { %p907_p7 = scmp.ne.s32.totalorder %s1108_s2, %s906_s8  ;;  %p910_p8 = scmp.lt.u32.totalorder %s906_s8, %s1108_s2 }
 0x17c   :  { %p912_p9 = pnand %p910_p8, %p907_p7 }
 0x17e   :  { %915 = shalt.err (!%p912_p9)
}
 0x17f   :  { %835 = dma.vmem_to_hbm [thread:$0]  %s833_s4, 128, %s1108_s2, [#allocation7]  }
 0x180   :  { %920 = dma.done.wait [#allocation7], 128  }
 0x181   :  { %921 = vsyncadd [#allocation7], 4294967168 }
 0x182   :  { %839 = vsyncpa [#allocation6], 1 }
 0x183   :  { %840 = vsyncpa [#allocation9], 1 }
 0x184   :  { %841 = vsyncpa [#allocation7], 1 }

</bundles_post_ra>
